<compile_context>
chip_gen: v6e
topology: v6e:2x2x1
jax: 0.10.0
libtpu: 0.0.40
codegen_flags: <defaults>
</compile_context>

<pallas_src>
import functools

import jax
import jax.numpy as jnp
import numpy as np
from jax.experimental import pallas as pl
from jax.experimental.pallas import tpu as pltpu

EPS = 1e-5
LANE = 128


# ------------------------------ small helpers ------------------------------
def _round_up(x, m):
    return (x + m - 1) // m * m


def _pad_axis_to(a, axis, size):
    pad = size - a.shape[axis]
    if pad <= 0:
        return a
    widths = [(0, 0)] * a.ndim
    widths[axis] = (0, pad)
    return jnp.pad(a, widths)


def _pick_tile_m(m, preferred=512):
    # Largest tile that divides M (big tiles amortize per-grid-step overhead).
    for cand in (preferred, 1024, 512, 256, 128, 64, 32, 16, 8):
        if cand <= m and m % cand == 0:
            return cand
    return m


def _pick_row_block(ho, wo, target_rows=128):
    # Largest divisor RB of Ho with RB*Wo <= ~128 output rows per step.
    best = 1
    for rb in range(1, ho + 1):
        if ho % rb == 0 and rb * wo <= max(target_rows, wo):
            best = rb
    return best


def _vmem_limit_bytes():
    kind = ""
    try:
        kind = jax.devices()[0].device_kind.lower()
    except Exception:
        pass
    if "v7" in kind:
        return 48 * 1024 * 1024    # 64 MiB physical -> leave headroom
    if "v6" in kind:
        return 96 * 1024 * 1024    # 128 MiB physical
    if "v5" in kind or "v4" in kind:
        return 64 * 1024 * 1024
    return None                    # unknown chip: keep compiler default


_VMEM_LIMIT = _vmem_limit_bytes()


def _bn_coeffs(total, total_sq, count, gamma, beta):
    # Per-channel scale/shift from sufficient statistics (tiny 1 x C math).
    mean = total / count
    var = jnp.maximum(total_sq / count - mean * mean, 0.0)
    scale = gamma * jax.lax.rsqrt(var + EPS)
    shift = beta - mean * scale
    return scale, shift


# ----------------------------- Pallas kernels ------------------------------
def _mm_stats_kernel(s_ref, h_ref, x_ref, w_ref, y_ref, sum_ref, ssq_ref, *,
                     act_in):
    """y = (optionally relu(x*scale+shift)) @ w  plus per-tile channel stats.

    Stats are written as *per-tile partials* (one (1,1,C) block per grid
    step), so no cross-step accumulation exists and the grid axis is fully
    parallel (megacore-friendly).  The wrapper reduces them.
    """
    x = x_ref[...]
    if act_in:  # fused batch-norm apply + ReLU of the previous layer (f32)
        x = jnp.maximum(x * s_ref[...] + h_ref[...], 0.0)
    y = jnp.dot(x.astype(jnp.bfloat16), w_ref[...],
                preferred_element_type=jnp.float32)
    y_ref[...] = y.astype(y_ref.dtype)                 # bf16 intermediate
    sum_ref[...] = jnp.sum(y, axis=0).reshape(1, 1, -1)
    ssq_ref[...] = jnp.sum(y * y, axis=0).reshape(1, 1, -1)


def _conv3x3_stats_kernel(x_ref, w2_ref, s_ref, h_ref,
                          y_ref, sum_ref, ssq_ref, apad_ref, *,
                          H, W, Wo, RB, stride):
    """3x3 conv (pad=1, stride) with fused bn1-apply+ReLU and bn2 statistics.

    Grid = (N, row_blocks).  At rb==0 the bn1-activated image is staged into
    a flat zero-bordered VMEM scratch of shape ((H+2)*(W+2), C).  Each row
    block then accumulates the 9 (kh,kw) taps with MXU matmuls:
      * stride 1: one contiguous (RB*(W+2)-2, C) slab per tap (big M),
      * stride 2: per output row, strided (stride=2) column reads (no
        selection matmul).
    Stats accumulate across row blocks into a per-image (1,1,C) block.
    """
    rb = pl.program_id(1)
    Wp2 = W + 2
    C = w2_ref.shape[2]

    @pl.when(rb == 0)
    def _stage():
        sum_ref[...] = jnp.zeros(sum_ref.shape, sum_ref.dtype)
        ssq_ref[...] = jnp.zeros(ssq_ref.shape, ssq_ref.dtype)
        # Zero the whole scratch (border must be zero for this image).
        apad_ref[...] = jnp.zeros(apad_ref.shape, apad_ref.dtype)
        scale = s_ref[...]                      # (1, P) f32
        shift = h_ref[...]
        for r in range(H):                      # per-row bn1 apply + ReLU
            a_r = jnp.maximum(x_ref[0, r] * scale + shift, 0.0)   # (W, P) f32
            base = (r + 1) * Wp2 + 1
            apad_ref[base:base + W, :] = a_r.astype(apad_ref.dtype)

    ho0 = rb * RB
    loc_s = jnp.zeros((1, C), jnp.float32)
    loc_q = jnp.zeros((1, C), jnp.float32)

    if stride == 1:
        # One big contiguous slab per tap; rows of the slab at positions
        # j*(W+2)+wo (wo < W) hold output (ho0+j, wo); the 2 pad columns per
        # row are junk and are simply never stored / counted.
        Mt = RB * Wp2 - 2
        acc = jnp.zeros((Mt, C), jnp.float32)
        base = ho0 * Wp2
        for dh in range(3):
            for dw in range(3):
                xw = apad_ref[pl.ds(base + dh * Wp2 + dw, Mt), :]
                acc = acc + jnp.dot(xw, w2_ref[3 * dh + dw],
                                    preferred_element_type=jnp.float32)
        for j in range(RB):
            rv = acc[j * Wp2:j * Wp2 + Wo, :]
            y_ref[j * Wo:(j + 1) * Wo, :] = rv.astype(y_ref.dtype)
            loc_s = loc_s + jnp.sum(rv, axis=0, keepdims=True)
            loc_q = loc_q + jnp.sum(rv * rv, axis=0, keepdims=True)
    else:
        # stride 2: strided column reads (stride=2) replace the old selection
        # matmul.  TODO(synk): block several output rows per tap matmul here
        # too (M is only Wo per matmul on the strided path).
        for j in range(RB):
            pr0 = (ho0 + j) * 2
            accj = jnp.zeros((Wo, C), jnp.float32)
            for dh in range(3):
                rowbase = (pr0 + dh) * Wp2
                for dw in range(3):
                    xw = apad_ref[pl.ds(rowbase + dw, Wo, stride=2), :]
                    accj = accj + jnp.dot(xw, w2_ref[3 * dh + dw],
                                          preferred_element_type=jnp.float32)
            y_ref[j * Wo:(j + 1) * Wo, :] = accj.astype(y_ref.dtype)
            loc_s = loc_s + jnp.sum(accj, axis=0, keepdims=True)
            loc_q = loc_q + jnp.sum(accj * accj, axis=0, keepdims=True)

    sum_ref[...] += loc_s.reshape(1, 1, C)
    ssq_ref[...] += loc_q.reshape(1, 1, C)


def _bn_add_relu_kernel(y_ref, s_ref, h_ref, r_ref, sd_ref, hd_ref, o_ref):
    # out = relu(bn3(y3) + bn_d(residual))  -- fused multiply-add epilogue.
    o_ref[...] = jnp.maximum(
        y_ref[...] * s_ref[...] + h_ref[...]
        + r_ref[...] * sd_ref[...] + hd_ref[...], 0.0)


# --------------------------- pallas_call wrappers ---------------------------
def matmul_stats(x, w, in_scale=None, in_shift=None, *, block_m=512):
    M, K = x.shape
    C = w.shape[1]
    act_in = in_scale is not None
    if not act_in:
        in_scale = jnp.ones((1, K), jnp.float32)
        in_shift = jnp.zeros((1, K), jnp.float32)
    tm = _pick_tile_m(M, block_m)
    nt = M // tm
    kernel = functools.partial(_mm_stats_kernel, act_in=act_in)
    y, s, q = pl.pallas_call(
        kernel,
        grid=(nt,),
        in_specs=[
            pl.BlockSpec((1, K), lambda i: (0, 0)),
            pl.BlockSpec((1, K), lambda i: (0, 0)),
            pl.BlockSpec((tm, K), lambda i: (i, 0)),
            pl.BlockSpec((K, C), lambda i: (0, 0)),
        ],
        out_specs=[
            pl.BlockSpec((tm, C), lambda i: (i, 0)),
            pl.BlockSpec((1, 1, C), lambda i: (i, 0, 0)),
            pl.BlockSpec((1, 1, C), lambda i: (i, 0, 0)),
        ],
        out_shape=[
            jax.ShapeDtypeStruct((M, C), jnp.bfloat16),        # bf16 output
            jax.ShapeDtypeStruct((nt, 1, C), jnp.float32),     # partial sums
            jax.ShapeDtypeStruct((nt, 1, C), jnp.float32),
        ],
        compiler_params=pltpu.CompilerParams(
            dimension_semantics=("parallel",),
            vmem_limit_bytes=_VMEM_LIMIT),
    )(in_scale, in_shift, x, w)
    return y, jnp.sum(s, axis=0), jnp.sum(q, axis=0)


def conv3x3_stats(x_img, w2, in_scale, in_shift, *, stride, Ho, Wo):
    N, H, W, P = x_img.shape
    C = w2.shape[-1]
    RB = _pick_row_block(Ho, Wo)
    n_rb = Ho // RB
    M2 = N * Ho * Wo
    kernel = functools.partial(_conv3x3_stats_kernel,
                               H=H, W=W, Wo=Wo, RB=RB, stride=stride)
    y, s, q = pl.pallas_call(
        kernel,
        grid=(N, n_rb),
        in_specs=[
            pl.BlockSpec((1, H, W, P), lambda n, r: (n, 0, 0, 0)),
            pl.BlockSpec((9, P, C), lambda n, r: (0, 0, 0)),
            pl.BlockSpec((1, P), lambda n, r: (0, 0)),
            pl.BlockSpec((1, P), lambda n, r: (0, 0)),
        ],
        out_specs=[
            pl.BlockSpec((RB * Wo, C), lambda n, r: (n * n_rb + r, 0)),
            pl.BlockSpec((1, 1, C), lambda n, r: (n, 0, 0)),
            pl.BlockSpec((1, 1, C), lambda n, r: (n, 0, 0)),
        ],
        out_shape=[
            jax.ShapeDtypeStruct((M2, C), jnp.bfloat16),       # bf16 output
            jax.ShapeDtypeStruct((N, 1, C), jnp.float32),      # per-image sums
            jax.ShapeDtypeStruct((N, 1, C), jnp.float32),
        ],
        scratch_shapes=[pltpu.VMEM(((H + 2) * (W + 2), P), jnp.bfloat16)],
        compiler_params=pltpu.CompilerParams(
            dimension_semantics=("parallel", "arbitrary"),
            vmem_limit_bytes=_VMEM_LIMIT),
    )(x_img, w2, in_scale, in_shift)
    return y, jnp.sum(s, axis=0), jnp.sum(q, axis=0)


def bn_add_relu(y, scale, shift, res, res_scale, res_shift, *, block_m=512):
    M, C = y.shape
    tm = _pick_tile_m(M, block_m)
    return pl.pallas_call(
        _bn_add_relu_kernel,
        grid=(M // tm,),
        in_specs=[
            pl.BlockSpec((tm, C), lambda i: (i, 0)),
            pl.BlockSpec((1, C), lambda i: (0, 0)),
            pl.BlockSpec((1, C), lambda i: (0, 0)),
            pl.BlockSpec((tm, C), lambda i: (i, 0)),
            pl.BlockSpec((1, C), lambda i: (0, 0)),
            pl.BlockSpec((1, C), lambda i: (0, 0)),
        ],
        out_specs=pl.BlockSpec((tm, C), lambda i: (i, 0)),
        out_shape=jax.ShapeDtypeStruct((M, C), jnp.float32),
        compiler_params=pltpu.CompilerParams(
            dimension_semantics=("parallel",),
            vmem_limit_bytes=_VMEM_LIMIT),
    )(y, scale, shift, res, res_scale, res_shift)


# ------------------------------- glue (JAX) --------------------------------
def bottleneck_forward(x_nchw, params, stride):
    N, Cin, H, W = x_nchw.shape
    planes = params["w1"].shape[1]
    C4 = 4 * planes

    Cp = _round_up(Cin, LANE)
    Pp = _round_up(planes, LANE)
    C4p = _round_up(C4, LANE)

    Ho = (H - 1) // stride + 1
    Wo = (W - 1) // stride + 1
    M1, M2 = N * H * W, N * Ho * Wo

    assert stride in (1, 2)
    # TODO(synk): spatial dims not divisible by 8 (e.g. a 7x7 stage) need an
    # extra masked / padded output-row path which is not implemented here.
    assert W % 8 == 0 and Wo % 8 == 0 and H % 2 == 0

    # layout glue (XLA): NCHW -> NHWC, lane-dense channel pad, bf16 storage.
    x = jnp.transpose(x_nchw, (0, 2, 3, 1)).astype(jnp.float32)
    xp = _pad_axis_to(x, 3, Cp).astype(jnp.bfloat16)
    xm = xp.reshape(M1, Cp)

    w1 = _pad_axis_to(_pad_axis_to(params["w1"], 0, Cp), 1, Pp).astype(jnp.bfloat16)
    w2 = _pad_axis_to(_pad_axis_to(params["w2"], 1, Pp), 2, Pp).astype(jnp.bfloat16)
    w3 = _pad_axis_to(_pad_axis_to(params["w3"], 0, Pp), 1, C4p).astype(jnp.bfloat16)
    g1, b1 = _pad_axis_to(params["g1"], 1, Pp), _pad_axis_to(params["b1"], 1, Pp)
    g2, b2 = _pad_axis_to(params["g2"], 1, Pp), _pad_axis_to(params["b2"], 1, Pp)
    g3, b3 = _pad_axis_to(params["g3"], 1, C4p), _pad_axis_to(params["b3"], 1, C4p)

    # conv1 (1x1) + bn1 sufficient statistics
    y1, s1, q1 = matmul_stats(xm, w1)
    sc1, sh1 = _bn_coeffs(s1, q1, M1, g1, b1)

    # conv2 (3x3, stride, pad 1) with fused bn1-apply+ReLU + bn2 statistics
    y2, s2, q2 = conv3x3_stats(y1.reshape(N, H, W, Pp), w2, sc1, sh1,
                               stride=stride, Ho=Ho, Wo=Wo)
    sc2, sh2 = _bn_coeffs(s2, q2, M2, g2, b2)

    # conv3 (1x1) with fused bn2-apply+ReLU + bn3 statistics
    y3, s3, q3 = matmul_stats(y2, w3, in_scale=sc2, in_shift=sh2)
    sc3, sh3 = _bn_coeffs(s3, q3, M2, g3, b3)

    # residual path
    if "wd" in params:
        wd = _pad_axis_to(_pad_axis_to(params["wd"], 0, Cp), 1, C4p).astype(jnp.bfloat16)
        gd = _pad_axis_to(params["gd"], 1, C4p)
        bd = _pad_axis_to(params["bd"], 1, C4p)
        # TODO(synk): fold this strided subsample into a Pallas BlockSpec /
        # the conv2 kernel instead of a wrapper-level XLA slice.
        xd = xp[:, ::stride, ::stride, :].reshape(M2, Cp)
        yd, sd_, qd = matmul_stats(xd, wd)
        scd, shd = _bn_coeffs(sd_, qd, M2, gd, bd)
        res = yd
    else:
        res = xm
        scd = jnp.ones((1, C4p), jnp.float32)
        shd = jnp.zeros((1, C4p), jnp.float32)

    # bn3-apply + residual-bn apply + add + ReLU (single fused epilogue)
    out = bn_add_relu(y3, sc3, sh3, res, scd, shd)

    out = out.reshape(N, Ho, Wo, C4p)[..., :C4]
    return jnp.transpose(out, (0, 3, 1, 2))  # back to NCHW


# --------------------------- pure-JAX reference -----------------------------
def _mm_ref(a, w):
    return jnp.dot(a.astype(jnp.bfloat16), w.astype(jnp.bfloat16),
                   preferred_element_type=jnp.float32)


def _bn_coeffs_from(y, gamma, beta):
    m = y.shape[0]
    s = jnp.sum(y, axis=0, keepdims=True)
    q = jnp.sum(y * y, axis=0, keepdims=True)
    return _bn_coeffs(s, q, m, gamma, beta)


def _to_bf16_f32(y):
    # mirror the kernel's bf16 HBM storage of intermediates
    return y.astype(jnp.bfloat16).astype(jnp.float32)


def bottleneck_ref(x_nchw, params, stride):
    N, Cin, H, W = x_nchw.shape
    planes = params["w1"].shape[1]
    Ho = (H - 1) // stride + 1
    Wo = (W - 1) // stride + 1
    x = jnp.transpose(x_nchw, (0, 2, 3, 1)).astype(jnp.float32)

    y1 = _mm_ref(x.reshape(-1, Cin), params["w1"])
    sc1, sh1 = _bn_coeffs_from(y1, params["g1"], params["b1"])
    a1 = jnp.maximum(_to_bf16_f32(y1) * sc1 + sh1, 0.0)
    a1 = a1.reshape(N, H, W, planes)

    a1p = jnp.pad(a1, ((0, 0), (1, 1), (1, 1), (0, 0)))
    y2 = jnp.zeros((N * Ho * Wo, planes), jnp.float32)
    for t in range(9):
        dh, dw = divmod(t, 3)
        win = a1p[:, dh:dh + (Ho - 1) * stride + 1:stride,
                  dw:dw + (Wo - 1) * stride + 1:stride, :]
        y2 = y2 + _mm_ref(win.reshape(-1, planes), params["w2"][t])
    sc2, sh2 = _bn_coeffs_from(y2, params["g2"], params["b2"])
    a2 = jnp.maximum(_to_bf16_f32(y2) * sc2 + sh2, 0.0)

    y3 = _mm_ref(a2, params["w3"])
    sc3, sh3 = _bn_coeffs_from(y3, params["g3"], params["b3"])
    o3 = _to_bf16_f32(y3) * sc3 + sh3

    if "wd" in params:
        xd = x[:, ::stride, ::stride, :].reshape(-1, Cin)
        yd = _mm_ref(xd, params["wd"])
        scd, shd = _bn_coeffs_from(yd, params["gd"], params["bd"])
        res = _to_bf16_f32(yd) * scd + shd
    else:
        res = _to_bf16_f32(x.reshape(-1, Cin))

    out = jnp.maximum(o3 + res, 0.0)
    return jnp.transpose(out.reshape(N, Ho, Wo, 4 * planes), (0, 3, 1, 2))


# ------------------------------ param setup --------------------------------
def make_params(key, inplanes, planes, stride):
    ks = jax.random.split(key, 12)
    p = {
        "w1": 0.1 * jax.random.normal(ks[0], (inplanes, planes), jnp.float32),
        # 3x3 conv weight stored per tap: w2[3*kh+kw][cin, cout]
        "w2": 0.1 * jax.random.normal(ks[1], (9, planes, planes), jnp.float32),
        "w3": 0.1 * jax.random.normal(ks[2], (planes, planes * 4), jnp.float32),
        "g1": 1.0 + 0.1 * jax.random.normal(ks[3], (1, planes), jnp.float32),
        "b1": 0.1 * jax.random.normal(ks[4], (1, planes), jnp.float32),
        "g2": 1.0 + 0.1 * jax.random.normal(ks[5], (1, planes), jnp.float32),
        "b2": 0.1 * jax.random.normal(ks[6], (1, planes), jnp.float32),
        "g3": 1.0 + 0.1 * jax.random.normal(ks[7], (1, planes * 4), jnp.float32),
        "b3": 0.1 * jax.random.normal(ks[8], (1, planes * 4), jnp.float32),
    }
    if stride != 1 or inplanes != planes * 4:
        p["wd"] = 0.1 * jax.random.normal(ks[9], (inplanes, planes * 4),
                                          jnp.float32)
        p["gd"] = 1.0 + 0.1 * jax.random.normal(ks[10], (1, planes * 4),
                                                jnp.float32)
        p["bd"] = 0.1 * jax.random.normal(ks[11], (1, planes * 4), jnp.float32)
    return p


if __name__ == "__main__":
    key = jax.random.PRNGKey(0)
    k_x, k_p = jax.random.split(key)
    inplanes, planes = 4, 4
    x = jax.random.normal(k_x, (2, inplanes, 16, 16), jnp.float32)  # NCHW

    for stride in (1, 2):
        params = make_params(k_p, inplanes, planes, stride)
        out = jax.block_until_ready(bottleneck_forward(x, params, stride))
        ref = jax.block_until_ready(bottleneck_ref(x, params, stride))
        exp_hw = (16 - 1) // stride + 1
        assert out.shape == (2, planes * 4, exp_hw, exp_hw)
        np.testing.assert_allclose(np.asarray(out), np.asarray(ref),
                                   rtol=5e-3, atol=5e-3)

    print("KERNEL_OK")
</pallas_src>

<mosaic_0001>
module attributes {stable_mosaic.version = 11 : i64} {
  func.func @_mm_stats_kernel(%arg0: i32, %arg1: memref<1x128xf32, #tpu.memory_space<vmem>>, %arg2: memref<1x128xf32, #tpu.memory_space<vmem>>, %arg3: memref<512x128xbf16, #tpu.memory_space<vmem>>, %arg4: memref<128x128xbf16, #tpu.memory_space<vmem>>, %arg5: memref<512x128xbf16, #tpu.memory_space<vmem>>, %arg6: memref<1x1x128xf32, #tpu.memory_space<vmem>>, %arg7: memref<1x1x128xf32, #tpu.memory_space<vmem>>) attributes {dimension_semantics = [#tpu.dimension_semantics<parallel>], iteration_bounds = array<i64: 1>, scalar_prefetch = 0 : i64, scratch_operands = 0 : i64, tpu.core_type = #tpu.core_type<tc>, window_params = [{pipeline_mode = #tpu.pipeline_mode<synchronous>, transform_indices = @transform_0, window_bounds = array<i64: 1, 128>}, {pipeline_mode = #tpu.pipeline_mode<synchronous>, transform_indices = @transform_1, window_bounds = array<i64: 1, 128>}, {transform_indices = @transform_2, window_bounds = array<i64: 512, 128>}, {pipeline_mode = #tpu.pipeline_mode<synchronous>, transform_indices = @transform_3, window_bounds = array<i64: 128, 128>}, {transform_indices = @transform_4, window_bounds = array<i64: 512, 128>}, {transform_indices = @transform_5, window_bounds = array<i64: 1, 1, 128>}, {transform_indices = @transform_6, window_bounds = array<i64: 1, 1, 128>}]} {
    %c0 = arith.constant 0 : index
    %c0_0 = arith.constant 0 : index
    %0 = vector.load %arg3[%c0, %c0_0] : memref<512x128xbf16, #tpu.memory_space<vmem>>, vector<512x128xbf16>
    %c0_1 = arith.constant 0 : index
    %c0_2 = arith.constant 0 : index
    %1 = vector.load %arg4[%c0_1, %c0_2] : memref<128x128xbf16, #tpu.memory_space<vmem>>, vector<128x128xbf16>
    %cst = arith.constant dense<0.000000e+00> : vector<512x128xf32>
    %2 = tpu.matmul %0, %1, %cst {dimension_numbers = #tpu.dot_dimension_numbers<[1], [0], [0], [1], [0, 0, 1, 1], [], []>} : vector<512x128xbf16>, vector<128x128xbf16>, vector<512x128xf32> -> vector<512x128xf32>
    %3 = arith.truncf %2 : vector<512x128xf32> to vector<512x128xbf16>
    %c0_3 = arith.constant 0 : index
    %c0_4 = arith.constant 0 : index
    %4 = vector.load %arg5[%c0_3, %c0_4] : memref<512x128xbf16, #tpu.memory_space<vmem>>, vector<512x128xbf16>
    tpu.vector_store %arg5[%c0_3, %c0_4], %3 {strides = array<i32>} : memref<512x128xbf16, #tpu.memory_space<vmem>>, vector<512x128xbf16>,
    %cst_5 = arith.constant dense<0.000000e+00> : vector<128xf32>
    %5 = vector.multi_reduction <add>, %2, %cst_5 [0] : vector<512x128xf32> to vector<128xf32>
    %6 = vector.shape_cast %5 : vector<128xf32> to vector<1x1x128xf32>
    %c0_6 = arith.constant 0 : index
    %c0_7 = arith.constant 0 : index
    %c0_8 = arith.constant 0 : index
    %7 = vector.load %arg6[%c0_6, %c0_7, %c0_8] : memref<1x1x128xf32, #tpu.memory_space<vmem>>, vector<1x1x128xf32>
    tpu.vector_store %arg6[%c0_6, %c0_7, %c0_8], %6 {strides = array<i32>} : memref<1x1x128xf32, #tpu.memory_space<vmem>>, vector<1x1x128xf32>,
    %8 = arith.mulf %2, %2 : vector<512x128xf32>
    %cst_9 = arith.constant dense<0.000000e+00> : vector<128xf32>
    %9 = vector.multi_reduction <add>, %8, %cst_9 [0] : vector<512x128xf32> to vector<128xf32>
    %10 = vector.shape_cast %9 : vector<128xf32> to vector<1x1x128xf32>
    %c0_10 = arith.constant 0 : index
    %c0_11 = arith.constant 0 : index
    %c0_12 = arith.constant 0 : index
    %11 = vector.load %arg7[%c0_10, %c0_11, %c0_12] : memref<1x1x128xf32, #tpu.memory_space<vmem>>, vector<1x1x128xf32>
    tpu.vector_store %arg7[%c0_10, %c0_11, %c0_12], %10 {strides = array<i32>} : memref<1x1x128xf32, #tpu.memory_space<vmem>>, vector<1x1x128xf32>,
    return
  }
  func.func @transform_0(%arg0: i32) -> (i32, i32) {
    %c0_i32 = arith.constant 0 : i32
    %c0_i32_0 = arith.constant 0 : i32
    %c0_i32_1 = arith.constant 0 : i32
    return %c0_i32, %c0_i32_0 : i32, i32
  }
  func.func @transform_1(%arg0: i32) -> (i32, i32) {
    %c0_i32 = arith.constant 0 : i32
    %c0_i32_0 = arith.constant 0 : i32
    %c0_i32_1 = arith.constant 0 : i32
    return %c0_i32, %c0_i32_0 : i32, i32
  }
  func.func @transform_2(%arg0: i32) -> (i32, i32) {
    %c0_i32 = arith.constant 0 : i32
    %c0_i32_0 = arith.constant 0 : i32
    return %arg0, %c0_i32 : i32, i32
  }
  func.func @transform_3(%arg0: i32) -> (i32, i32) {
    %c0_i32 = arith.constant 0 : i32
    %c0_i32_0 = arith.constant 0 : i32
    %c0_i32_1 = arith.constant 0 : i32
    return %c0_i32, %c0_i32_0 : i32, i32
  }
  func.func @transform_4(%arg0: i32) -> (i32, i32) {
    %c0_i32 = arith.constant 0 : i32
    %c0_i32_0 = arith.constant 0 : i32
    return %arg0, %c0_i32 : i32, i32
  }
  func.func @transform_5(%arg0: i32) -> (i32, i32, i32) {
    %c0_i32 = arith.constant 0 : i32
    %c0_i32_0 = arith.constant 0 : i32
    %c0_i32_1 = arith.constant 0 : i32
    return %arg0, %c0_i32, %c0_i32_0 : i32, i32, i32
  }
  func.func @transform_6(%arg0: i32) -> (i32, i32, i32) {
    %c0_i32 = arith.constant 0 : i32
    %c0_i32_0 = arith.constant 0 : i32
    %c0_i32_1 = arith.constant 0 : i32
    return %arg0, %c0_i32, %c0_i32_0 : i32, i32, i32
  }
}

</mosaic_0001>

<bundles_post_ra>
// kernel: tpu_custom_call.1
= control target key start
LH: loop header
LB: loop body
LE: loop exit
PB: predicated region body
PF: predicated region fallthrough
CT: control target
= control target key end

     0   :  { %12 = vsyncpa [#allocation3], 0  ;;  %s2173_s0 = inlined_call_operand.hbm [shape: f32[1,128], index: 0, kind: input, shape index: {}]   ;;  %s2174_s1 = inlined_call_operand.vmem [shape: f32[1,128], index: 1, kind: input, shape index: {}]   ;;  %s2175_s2 = inlined_call_operand.hbm [shape: bf16[512,128], index: 2, kind: input, shape index: {}]   ;;  %s2176_s3 = inlined_call_operand.hbm [shape: bf16[128,128], index: 3, kind: input, shape index: {}]   ;;  %s2177_s4 = inlined_call_operand.hbm [shape: bf16[512,128], index: 4, kind: output, shape index: {0}]   ;;  %s2178_s5 = inlined_call_operand.hbm [shape: f32[1,1,128], index: 5, kind: output, shape index: {1}]   ;;  %s2179_s6 = inlined_call_operand.hbm [shape: f32[1,1,128], index: 6, kind: output, shape index: {2}]  }
   0x1   :  { %13 = vsyncpa [#allocation6], 0 }
   0x2   :  { %14 = vsyncpa [#allocation4], 0 }
   0x3   :  { %15 = vsyncpa [#allocation10], 0  ;;  %s1911_s1 = smov [#allocation5]  }
   0x4   :  { %s33_s21 = sshll.u32 %s1911_s1, 4  ;;  %s34_s21 = int_to_ptr.vmem [resolvable:$true] %s33_s21 }
   0x5   :  { %s1791_s22 = scalar_lea.vmem %s34_s21, 4096  ;;  %p1796_p1 = scmp.lt.s32.totalorder %s34_s21, %s34_s21 }
   0x6   :  { %p1792_p0 = scmp.ne.s32.totalorder %s34_s21, %s1791_s22  ;;  %p1797_p2 = scmp.lt.s32.totalorder %s1791_s22, %s1791_s22 }
   0x8   :  { %p1798_p3 = por %p1797_p2, %p1796_p1 }
   0xa   :  { %p1799_p4 = pnand %p1798_p3, %p1792_p0 }
   0xc   :  { %1802 = shalt.err (!%p1799_p4)
}
   0xd   :  { %s1912_s23 = smov 64   ;;  %s1913_s24 = smov 4  }
   0xe   :  { %39 = dma.hbm_to_vmem [thread:$0]  %s2175_s2, 4096, %s34_s21, [#allocation6], %s1912_s23, %s1912_s23, %s1913_s24  }
   0xf   :  { %s1914_s27 = smov [#allocation2]   ;;  %s1915_s29 = smov [#allocation7]  }
  0x10   :  { %s22_s28 = sshll.u32 %s1914_s27, 4  ;;  %s45_s30 = sshll.u32 %s1915_s29, 4  ;;  %s23_s28 = int_to_ptr.vmem [resolvable:$true] %s22_s28  ;;  %s46_s30 = int_to_ptr.vmem [resolvable:$true] %s45_s30 }
  0x11   :  { %s1811_s7 = scalar_lea.vmem %s23_s28, 16  ;;  %s1815_s8 = scalar_lea.vmem %s23_s28, 32 }
  0x12   :  { %p1812_p5 = scmp.ne.s32.totalorder %s23_s28, %s1811_s7  ;;  %p1816_p6 = scmp.lt.s32.totalorder %s23_s28, %s23_s28 }
  0x13   :  { %p1817_p7 = scmp.lt.s32.totalorder %s1815_s8, %s1811_s7 }
  0x15   :  { %p1818_p8 = por %p1817_p7, %p1816_p6 }
  0x17   :  { %p1819_p9 = pnand %p1818_p8, %p1812_p5 }
  0x19   :  { %1822 = shalt.err (!%p1819_p9)
}
  0x1a   :  { %25 = dma.hbm_to_vmem [thread:$0]  %s2173_s0, 16, %s23_s28, [#allocation3]  }
  0x1b   :  { %s1831_s11 = scalar_lea.vmem %s46_s30, 1024  ;;  %p1836_p11 = scmp.lt.s32.totalorder %s46_s30, %s46_s30 }
  0x1c   :  { %p1832_p10 = scmp.ne.s32.totalorder %s46_s30, %s1831_s11  ;;  %p1837_p12 = scmp.lt.s32.totalorder %s1831_s11, %s1831_s11 }
  0x1e   :  { %p1838_p13 = por %p1837_p12, %p1836_p11 }
  0x20   :  { %p1839_p0 = pnand %p1838_p13, %p1832_p10 }
  0x22   :  { %1842 = shalt.err (!%p1839_p0)
}
  0x23   :  { %51 = dma.hbm_to_vmem [thread:$0]  %s2176_s3, 1024, %s46_s30, [#allocation6], %s1912_s23, %s1912_s23, %s1913_s24  }
  0x24   :  { %1903 = dma.done.wait [#allocation3], 16  }
  0x25   :  { %1904 = vsyncadd [#allocation3], 4294967280 }
  0x26   :  { %1905 = dma.done.wait [#allocation6], 5120  }
  0x27   :  { %1906 = vsyncadd [#allocation6], 4294962176  ;;  %v1743_v0 = vld [vmem:[#allocation7 + $0x38] sm:$0xff]   ;;  %v1744_v1 = vld [vmem:[#allocation7 + $0x30] sm:$0xff]   ;;  %s1916_s0 = smov [#allocation8]  }
  0x28   :  { %1639 = vmatprep.subr.bf16.mxu0 %v1743_v0  ;;  %1719 = vmatprep.subr.bf16.mxu1 %v1743_v0  ;;  %v1745_v2 = vld [vmem:[#allocation7 + $0x28] sm:$0xff]   ;;  %v1746_v3 = vld [vmem:[#allocation7 + $0x20] sm:$0xff]   ;;  %v1747_v5 = vld [vmem:[#allocation7 + $0x18] sm:$0xff]   ;;  %s1200_s3 = sshll.u32 %s1916_s0, 4  ;;  %s1201_s3 = int_to_ptr.vmem [resolvable:$true] %s1200_s3 }
  0x29   :  { %1640 = vmatpush3.bf16.msra.mxu0 %v1743_v0  ;;  %1727 = vmatpush3.bf16.msra.mxu1 %v1743_v0  ;;  %v1751_v4 = vld [vmem:[#allocation5] sm:$0xff]   ;;  %v1748_v6 = vld [vmem:[#allocation7 + $0x10] sm:$0xff]   ;;  %v1749_v7 = vld [vmem:[#allocation7 + $0x8] sm:$0xff]   ;;  %s1843_s13 = scalar_lea.vmem %s1201_s3, 4096  ;;  %p1848_p2 = scmp.lt.s32.totalorder %s1201_s3, %s1201_s3 }
  0x2a   :  { %1641 = vmatprep.subr.bf16.mxu0 %v1744_v1  ;;  %1720 = vmatprep.subr.bf16.mxu1 %v1744_v1  ;;  %v1750_v8 = vld [vmem:[#allocation7] sm:$0xff]   ;;  %v1752_v10 = vld [vmem:[#allocation5 + $0x8] sm:$0xff]   ;;  %v1753_v11 = vld [vmem:[#allocation5 + $0x10] sm:$0xff]   ;;  %p1844_p1 = scmp.ne.s32.totalorder %s1201_s3, %s1843_s13  ;;  %p1849_p3 = scmp.lt.s32.totalorder %s1843_s13, %s1843_s13 }
  0x2b   :  { %1655 = vmatprep.mubr.bf16.mxu0 %v1751_v4  ;;  %v1767_v9 = vld [vmem:[#allocation5 + $0x80] sm:$0xff]   ;;  %v1768_v12 = vld [vmem:[#allocation5 + $0x88] sm:$0xff]   ;;  %v1769_v13 = vld [vmem:[#allocation5 + $0x90] sm:$0xff]  }
  0x2c   :  { %1687 = vmatprep.mubr.bf16.mxu1 %v1767_v9  ;;  %v1754_v14 = vld [vmem:[#allocation5 + $0x18] sm:$0xff]   ;;  %v1755_v15 = vld [vmem:[#allocation5 + $0x20] sm:$0xff]   ;;  %v1756_v18 = vld [vmem:[#allocation5 + $0x28] sm:$0xff]   ;;  %p1850_p4 = por %p1849_p3, %p1848_p2 }
  0x2d   :  { %1642 = vmatpush3.bf16.msra.mxu0 %v1744_v1  ;;  %1728 = vmatpush3.bf16.msra.mxu1 %v1744_v1  ;;  %v1770_v16 = vld [vmem:[#allocation5 + $0x98] sm:$0xff]   ;;  %v1771_v17 = vld [vmem:[#allocation5 + $0xa0] sm:$0xff]   ;;  %v1772_v19 = vld [vmem:[#allocation5 + $0xa8] sm:$0xff]  }
  0x2e   :  { %1643 = vmatprep.subr.bf16.mxu0 %v1745_v2  ;;  %1721 = vmatprep.subr.bf16.mxu1 %v1745_v2  ;;  %v1757_v20 = vld [vmem:[#allocation5 + $0x30] sm:$0xff]   ;;  %v1758_v22 = vld [vmem:[#allocation5 + $0x38] sm:$0xff]   ;;  %v1759_v24 = vld [vmem:[#allocation5 + $0x40] sm:$0xff]   ;;  %p1851_p5 = pnand %p1850_p4, %p1844_p1 }
  0x2f   :  { %v1773_v21 = vld [vmem:[#allocation5 + $0xb0] sm:$0xff]   ;;  %v1774_v23 = vld [vmem:[#allocation5 + $0xb8] sm:$0xff]   ;;  %v1775_v25 = vld [vmem:[#allocation5 + $0xc0] sm:$0xff]  }
  0x30   :  { %v1760_v26 = vld [vmem:[#allocation5 + $0x48] sm:$0xff]   ;;  %v1761_v28 = vld [vmem:[#allocation5 + $0x50] sm:$0xff]   ;;  %v1762_v30 = vld [vmem:[#allocation5 + $0x58] sm:$0xff]  }
  0x31   :  { %1644 = vmatpush3.bf16.msra.mxu0 %v1745_v2  ;;  %1729 = vmatpush3.bf16.msra.mxu1 %v1745_v2  ;;  %v1776_v27 = vld [vmem:[#allocation5 + $0xc8] sm:$0xff]   ;;  %v1777_v29 = vld [vmem:[#allocation5 + $0xd0] sm:$0xff]   ;;  %v1778_v31 = vld [vmem:[#allocation5 + $0xd8] sm:$0xff]  }
  0x32   :  { %1645 = vmatprep.subr.bf16.mxu0 %v1746_v3  ;;  %1722 = vmatprep.subr.bf16.mxu1 %v1746_v3  ;;  %v1763_v32 = vld [vmem:[#allocation5 + $0x60] sm:$0xff]   ;;  %v1764_v34 = vld [vmem:[#allocation5 + $0x68] sm:$0xff]   ;;  %v1765_v36 = vld [vmem:[#allocation5 + $0x70] sm:$0xff]  }
  0x33   :  { %v1779_v33 = vld [vmem:[#allocation5 + $0xe0] sm:$0xff]   ;;  %v1780_v35 = vld [vmem:[#allocation5 + $0xe8] sm:$0xff]   ;;  %v1781_v37 = vld [vmem:[#allocation5 + $0xf0] sm:$0xff]  }
  0x34   :  { %v1766_v38 = vld [vmem:[#allocation5 + $0x78] sm:$0xff]  }
  0x35   :  { %1646 = vmatpush3.bf16.msra.mxu0 %v1746_v3  ;;  %1730 = vmatpush3.bf16.msra.mxu1 %v1746_v3  ;;  %v1782_v39 = vld [vmem:[#allocation5 + $0xf8] sm:$0xff]  }
  0x36   :  { %1647 = vmatprep.subr.bf16.mxu0 %v1747_v5  ;;  %1723 = vmatprep.subr.bf16.mxu1 %v1747_v5 }
  0x39   :  { %1648 = vmatpush3.bf16.msra.mxu0 %v1747_v5  ;;  %1731 = vmatpush3.bf16.msra.mxu1 %v1747_v5 }
  0x3a   :  { %1649 = vmatprep.subr.bf16.mxu0 %v1748_v6  ;;  %1724 = vmatprep.subr.bf16.mxu1 %v1748_v6 }
  0x3d   :  { %1650 = vmatpush3.bf16.msra.mxu0 %v1748_v6  ;;  %1732 = vmatpush3.bf16.msra.mxu1 %v1748_v6 }
  0x3e   :  { %1651 = vmatprep.subr.bf16.mxu0 %v1749_v7  ;;  %1725 = vmatprep.subr.bf16.mxu1 %v1749_v7 }
  0x41   :  { %1652 = vmatpush3.bf16.msra.mxu0 %v1749_v7  ;;  %1733 = vmatpush3.bf16.msra.mxu1 %v1749_v7 }
  0x42   :  { %1653 = vmatprep.subr.bf16.mxu0 %v1750_v8  ;;  %1726 = vmatprep.subr.bf16.mxu1 %v1750_v8 }
  0x45   :  { %1654 = vmatpush3.bf16.msra.mxu0 %v1750_v8  ;;  %1734 = vmatpush3.bf16.msra.mxu1 %v1750_v8 }
  0x48   :  { %1656 = vmatmul.mubr.bf16.vlgmr.msra.gmra.mxu0 %v1752_v10  ;;  %1688 = vmatmul.mubr.bf16.vlgmr.msra.gmra.mxu1 %v1768_v12 }
  0x49   :  { %1659 = vmatprep.mubr.bf16.mxu0 %v1753_v11  ;;  %1691 = vmatprep.mubr.bf16.mxu1 %v1769_v13 }
  0x50   :  { %1660 = vmatmul.mubr.bf16.gmra.mxu0 %v1754_v14  ;;  %1692 = vmatmul.mubr.bf16.gmra.mxu1 %v1770_v16 }
  0x51   :  { %1663 = vmatprep.mubr.bf16.mxu0 %v1755_v15  ;;  %1695 = vmatprep.mubr.bf16.mxu1 %v1771_v17 }
  0x58   :  { %1664 = vmatmul.mubr.bf16.gmra.mxu0 %v1756_v18  ;;  %1696 = vmatmul.mubr.bf16.gmra.mxu1 %v1772_v19 }
  0x59   :  { %1667 = vmatprep.mubr.bf16.mxu0 %v1757_v20  ;;  %1699 = vmatprep.mubr.bf16.mxu1 %v1773_v21 }
  0x60   :  { %1668 = vmatmul.mubr.bf16.gmra.mxu0 %v1758_v22  ;;  %1700 = vmatmul.mubr.bf16.gmra.mxu1 %v1774_v23 }
  0x61   :  { %1671 = vmatprep.mubr.bf16.mxu0 %v1759_v24  ;;  %1703 = vmatprep.mubr.bf16.mxu1 %v1775_v25 }
  0x68   :  { %1672 = vmatmul.mubr.bf16.gmra.mxu0 %v1760_v26  ;;  %1704 = vmatmul.mubr.bf16.gmra.mxu1 %v1776_v27 }
  0x69   :  { %1675 = vmatprep.mubr.bf16.mxu0 %v1761_v28  ;;  %1707 = vmatprep.mubr.bf16.mxu1 %v1777_v29 }
  0x70   :  { %1676 = vmatmul.mubr.bf16.gmra.mxu0 %v1762_v30  ;;  %1708 = vmatmul.mubr.bf16.gmra.mxu1 %v1778_v31 }
  0x71   :  { %1679 = vmatprep.mubr.bf16.mxu0 %v1763_v32  ;;  %1711 = vmatprep.mubr.bf16.mxu1 %v1779_v33 }
  0x78   :  { %1680 = vmatmul.mubr.bf16.gmra.mxu0 %v1764_v34  ;;  %1712 = vmatmul.mubr.bf16.gmra.mxu1 %v1780_v35 }
  0x79   :  { %1683 = vmatprep.mubr.bf16.mxu0 %v1765_v36  ;;  %1715 = vmatprep.mubr.bf16.mxu1 %v1781_v37 }
  0x80   :  { %1684 = vmatmul.mubr.bf16.gmra.mxu0 %v1766_v38  ;;  %1716 = vmatmul.mubr.bf16.gmra.mxu1 %v1782_v39 }
 0x108   :  { %v1657_v40 = vpop.f32.mrf.mxu0  ;;  %v1969_v41 = vpop.f32.mrf.mxu1 }
 0x109   :  { %v1063_v57 = vmul.f32 %v1657_v40, %v1657_v40 }
 0x10a   :  { %v416_v42 = vpop.f32.mrf.mxu0  ;;  %v1971_v43 = vpop.f32.mrf.mxu1 }
 0x10b   :  { %v1061_v48 = vmul.f32 %v416_v42, %v416_v42 }
 0x10c   :  { %v1658_v44 = vpop.f32.mrf.mxu0  ;;  %v1973_v45 = vpop.f32.mrf.mxu1 }
 0x10d   :  { %v1416_v46 = vpack.c.bf16 %v1658_v44, %v1657_v40  ;;  %v1496_v47 = vpack.c.bf16 %v1973_v45, %v1969_v41  ;;  %v1064_v62 = vmul.f32 %v1658_v44, %v1658_v44 }
 0x10e   :  { %v419_v49 = vpop.f32.mrf.mxu0  ;;  %v1977_v50 = vpop.f32.mrf.mxu1 }
 0x10f   :  { %1568 = vst [vmem:[#allocation8 + $0x8] sm:$0xff] %v1416_v46   ;;  %v1411_v51 = vpack.c.bf16 %v419_v49, %v416_v42  ;;  %v991_v52 = vadd.f32 %v419_v49, %v416_v42  ;;  %v1062_v53 = vmul.f32 %v419_v49, %v419_v49  ;;  %1584 = vst [vmem:[#allocation8 + $0x88] sm:$0xff] %v1496_v47  }
 0x110   :  { %v1491_v54 = vpack.c.bf16 %v1977_v50, %v1971_v43  ;;  %v1661_v55 = vpop.f32.mrf.mxu0  ;;  %v1981_v56 = vpop.f32.mrf.mxu1 }
 0x111   :  { %1412 = vst [vmem:[#allocation8] sm:$0xff] %v1411_v51   ;;  %v992_v58 = vadd.f32 %v1657_v40, %v991_v52  ;;  %v1125_v59 = vadd.f32 %v1062_v53, %v1061_v48  ;;  %v1067_v17 = vmul.f32 %v1661_v55, %v1661_v55 }
 0x112   :  { %1583 = vst [vmem:[#allocation8 + $0x80] sm:$0xff] %v1491_v54   ;;  %v432_v60 = vpop.f32.mrf.mxu0  ;;  %v1983_v61 = vpop.f32.mrf.mxu1 }
 0x113   :  { %v1126_v63 = vadd.f32 %v1125_v59, %v1063_v57  ;;  %v993_v0 = vadd.f32 %v1658_v44, %v992_v58  ;;  %v1065_v4 = vmul.f32 %v432_v60, %v432_v60 }
 0x114   :  { %v1662_v1 = vpop.f32.mrf.mxu0  ;;  %v1985_v2 = vpop.f32.mrf.mxu1 }
 0x115   :  { %v994_v3 = vadd.f32 %v993_v0, %v432_v60  ;;  %v1127_v5 = vadd.f32 %v1126_v63, %v1064_v62  ;;  %v1426_v6 = vpack.c.bf16 %v1662_v1, %v1661_v55  ;;  %v1506_v8 = vpack.c.bf16 %v1985_v2, %v1981_v56 }
 0x116   :  { %v435_v7 = vpop.f32.mrf.mxu0  ;;  %v1989_v9 = vpop.f32.mrf.mxu1  ;;  %v1068_v22 = vmul.f32 %v1662_v1, %v1662_v1 }
 0x117   :  { %v1128_v10 = vadd.f32 %v1127_v5, %v1065_v4  ;;  %1570 = vst [vmem:[#allocation8 + $0x18] sm:$0xff] %v1426_v6   ;;  %v1421_v11 = vpack.c.bf16 %v435_v7, %v432_v60  ;;  %v995_v12 = vadd.f32 %v994_v3, %v435_v7  ;;  %v1066_v13 = vmul.f32 %v435_v7, %v435_v7 }
 0x118   :  { %v1665_v14 = vpop.f32.mrf.mxu0  ;;  %1586 = vst [vmem:[#allocation8 + $0x98] sm:$0xff] %v1506_v8   ;;  %v1501_v15 = vpack.c.bf16 %v1989_v9, %v1983_v61  ;;  %v1993_v16 = vpop.f32.mrf.mxu1 }
 0x119   :  { %1569 = vst [vmem:[#allocation8 + $0x10] sm:$0xff] %v1421_v11   ;;  %v996_v18 = vadd.f32 %v1661_v55, %v995_v12  ;;  %v1129_v19 = vadd.f32 %v1128_v10, %v1066_v13  ;;  %v1071_v42 = vmul.f32 %v1665_v14, %v1665_v14 }
 0x11a   :  { %v448_v20 = vpop.f32.mrf.mxu0  ;;  %1585 = vst [vmem:[#allocation8 + $0x90] sm:$0xff] %v1501_v15   ;;  %v1995_v21 = vpop.f32.mrf.mxu1 }
 0x11b   :  { %v1130_v23 = vadd.f32 %v1129_v19, %v1067_v17  ;;  %v997_v24 = vadd.f32 %v1662_v1, %v996_v18  ;;  %v1069_v28 = vmul.f32 %v448_v20, %v448_v20 }
 0x11c   :  { %v1666_v25 = vpop.f32.mrf.mxu0  ;;  %v1997_v26 = vpop.f32.mrf.mxu1 }
 0x11d   :  { %v998_v27 = vadd.f32 %v997_v24, %v448_v20  ;;  %v1131_v29 = vadd.f32 %v1130_v23, %v1068_v22  ;;  %v1436_v30 = vpack.c.bf16 %v1666_v25, %v1665_v14  ;;  %v1516_v32 = vpack.c.bf16 %v1997_v26, %v1993_v16 }
 0x11e   :  { %v451_v31 = vpop.f32.mrf.mxu0  ;;  %v2001_v33 = vpop.f32.mrf.mxu1  ;;  %v1072_v49 = vmul.f32 %v1666_v25, %v1666_v25 }
 0x11f   :  { %v1132_v34 = vadd.f32 %v1131_v29, %v1069_v28  ;;  %1572 = vst [vmem:[#allocation8 + $0x28] sm:$0xff] %v1436_v30   ;;  %v1431_v35 = vpack.c.bf16 %v451_v31, %v448_v20  ;;  %v999_v36 = vadd.f32 %v998_v27, %v451_v31  ;;  %v1070_v37 = vmul.f32 %v451_v31, %v451_v31 }
 0x120   :  { %v1669_v38 = vpop.f32.mrf.mxu0  ;;  %1588 = vst [vmem:[#allocation8 + $0xa8] sm:$0xff] %v1516_v32   ;;  %v1511_v39 = vpack.c.bf16 %v2001_v33, %v1995_v21  ;;  %v2005_v40 = vpop.f32.mrf.mxu1 }
 0x121   :  { %1571 = vst [vmem:[#allocation8 + $0x20] sm:$0xff] %v1431_v35   ;;  %v1000_v44 = vadd.f32 %v1665_v14, %v999_v36  ;;  %v1133_v46 = vadd.f32 %v1132_v34, %v1070_v37  ;;  %v1075_v8 = vmul.f32 %v1669_v38, %v1669_v38 }
 0x122   :  { %v464_v47 = vpop.f32.mrf.mxu0  ;;  %1587 = vst [vmem:[#allocation8 + $0xa0] sm:$0xff] %v1511_v39   ;;  %v2007_v48 = vpop.f32.mrf.mxu1 }
 0x123   :  { %v1134_v51 = vadd.f32 %v1133_v46, %v1071_v42  ;;  %v1001_v52 = vadd.f32 %v1666_v25, %v1000_v44  ;;  %v1073_v57 = vmul.f32 %v464_v47, %v464_v47 }
 0x124   :  { %v1670_v53 = vpop.f32.mrf.mxu0  ;;  %v2009_v54 = vpop.f32.mrf.mxu1 }
 0x125   :  { %v1002_v55 = vadd.f32 %v1001_v52, %v464_v47  ;;  %v1135_v58 = vadd.f32 %v1134_v51, %v1072_v49  ;;  %v1446_v59 = vpack.c.bf16 %v1670_v53, %v1669_v38  ;;  %v1526_v62 = vpack.c.bf16 %v2009_v54, %v2005_v40 }
 0x126   :  { %v467_v60 = vpop.f32.mrf.mxu0  ;;  %v2013_v63 = vpop.f32.mrf.mxu1  ;;  %v1076_v14 = vmul.f32 %v1670_v53, %v1670_v53 }
 0x127   :  { %v1136_v0 = vadd.f32 %v1135_v58, %v1073_v57  ;;  %1574 = vst [vmem:[#allocation8 + $0x38] sm:$0xff] %v1446_v59   ;;  %v1441_v1 = vpack.c.bf16 %v467_v60, %v464_v47  ;;  %v1003_v3 = vadd.f32 %v1002_v55, %v467_v60  ;;  %v1074_v4 = vmul.f32 %v467_v60, %v467_v60 }
 0x128   :  { %v1673_v5 = vpop.f32.mrf.mxu0  ;;  %1590 = vst [vmem:[#allocation8 + $0xb8] sm:$0xff] %v1526_v62   ;;  %v1521_v6 = vpack.c.bf16 %v2013_v63, %v2007_v48  ;;  %v2017_v7 = vpop.f32.mrf.mxu1 }
 0x129   :  { %1573 = vst [vmem:[#allocation8 + $0x30] sm:$0xff] %v1441_v1   ;;  %v1004_v10 = vadd.f32 %v1669_v38, %v1003_v3  ;;  %v1137_v11 = vadd.f32 %v1136_v0, %v1074_v4  ;;  %v1079_v37 = vmul.f32 %v1673_v5, %v1673_v5 }
 0x12a   :  { %v480_v12 = vpop.f32.mrf.mxu0  ;;  %1589 = vst [vmem:[#allocation8 + $0xb0] sm:$0xff] %v1521_v6   ;;  %v2019_v13 = vpop.f32.mrf.mxu1 }
 0x12b   :  { %v1138_v15 = vadd.f32 %v1137_v11, %v1075_v8  ;;  %v1005_v17 = vadd.f32 %v1670_v53, %v1004_v10  ;;  %v1077_v22 = vmul.f32 %v480_v12, %v480_v12 }
 0x12c   :  { %v1674_v18 = vpop.f32.mrf.mxu0  ;;  %v2021_v19 = vpop.f32.mrf.mxu1 }
 0x12d   :  { %v1006_v20 = vadd.f32 %v1005_v17, %v480_v12  ;;  %v1139_v23 = vadd.f32 %v1138_v15, %v1076_v14  ;;  %v1456_v24 = vpack.c.bf16 %v1674_v18, %v1673_v5  ;;  %v1536_v27 = vpack.c.bf16 %v2021_v19, %v2017_v7 }
 0x12e   :  { %v483_v25 = vpop.f32.mrf.mxu0  ;;  %v2025_v28 = vpop.f32.mrf.mxu1  ;;  %v1080_v46 = vmul.f32 %v1674_v18, %v1674_v18 }
 0x12f   :  { %v1140_v29 = vadd.f32 %v1139_v23, %v1077_v22  ;;  %1576 = vst [vmem:[#allocation8 + $0x48] sm:$0xff] %v1456_v24   ;;  %v1451_v30 = vpack.c.bf16 %v483_v25, %v480_v12  ;;  %v1007_v31 = vadd.f32 %v1006_v20, %v483_v25  ;;  %v1078_v32 = vmul.f32 %v483_v25, %v483_v25 }
 0x130   :  { %v1677_v34 = vpop.f32.mrf.mxu0  ;;  %1592 = vst [vmem:[#allocation8 + $0xc8] sm:$0xff] %v1536_v27   ;;  %v1531_v35 = vpack.c.bf16 %v2025_v28, %v2019_v13  ;;  %v2029_v36 = vpop.f32.mrf.mxu1 }
 0x131   :  { %1575 = vst [vmem:[#allocation8 + $0x40] sm:$0xff] %v1451_v30   ;;  %v1008_v38 = vadd.f32 %v1673_v5, %v1007_v31  ;;  %v1141_v39 = vadd.f32 %v1140_v29, %v1078_v32  ;;  %v1083_v10 = vmul.f32 %v1677_v34, %v1677_v34 }
 0x132   :  { %v496_v42 = vpop.f32.mrf.mxu0  ;;  %1591 = vst [vmem:[#allocation8 + $0xc0] sm:$0xff] %v1531_v35   ;;  %v2031_v44 = vpop.f32.mrf.mxu1 }
 0x133   :  { %v1142_v47 = vadd.f32 %v1141_v39, %v1079_v37  ;;  %v1009_v49 = vadd.f32 %v1674_v18, %v1008_v38  ;;  %v1081_v55 = vmul.f32 %v496_v42, %v496_v42 }
 0x134   :  { %v1678_v51 = vpop.f32.mrf.mxu0  ;;  %v2033_v52 = vpop.f32.mrf.mxu1 }
 0x135   :  { %v1010_v53 = vadd.f32 %v1009_v49, %v496_v42  ;;  %v1143_v57 = vadd.f32 %v1142_v47, %v1080_v46  ;;  %v1466_v58 = vpack.c.bf16 %v1678_v51, %v1677_v34  ;;  %v1546_v60 = vpack.c.bf16 %v2033_v52, %v2029_v36 }
 0x136   :  { %v499_v59 = vpop.f32.mrf.mxu0  ;;  %v2037_v62 = vpop.f32.mrf.mxu1  ;;  %v1084_v17 = vmul.f32 %v1678_v51, %v1678_v51 }
 0x137   :  { %v1144_v0 = vadd.f32 %v1143_v57, %v1081_v55  ;;  %1578 = vst [vmem:[#allocation8 + $0x58] sm:$0xff] %v1466_v58   ;;  %v1461_v1 = vpack.c.bf16 %v499_v59, %v496_v42  ;;  %v1011_v3 = vadd.f32 %v1010_v53, %v499_v59  ;;  %v1082_v4 = vmul.f32 %v499_v59, %v499_v59 }
 0x138   :  { %v1681_v5 = vpop.f32.mrf.mxu0  ;;  %1594 = vst [vmem:[#allocation8 + $0xd8] sm:$0xff] %v1546_v60   ;;  %v1541_v6 = vpack.c.bf16 %v2037_v62, %v2031_v44  ;;  %v2041_v8 = vpop.f32.mrf.mxu1 }
 0x139   :  { %1577 = vst [vmem:[#allocation8 + $0x50] sm:$0xff] %v1461_v1   ;;  %v1012_v11 = vadd.f32 %v1677_v34, %v1011_v3  ;;  %v1145_v12 = vadd.f32 %v1144_v0, %v1082_v4  ;;  %v1087_v47 = vmul.f32 %v1681_v5, %v1681_v5 }
 0x13a   :  { %v512_v14 = vpop.f32.mrf.mxu0  ;;  %1593 = vst [vmem:[#allocation8 + $0xd0] sm:$0xff] %v1541_v6   ;;  %v2043_v15 = vpop.f32.mrf.mxu1 }
 0x13b   :  { %v1146_v18 = vadd.f32 %v1145_v12, %v1083_v10  ;;  %v1013_v20 = vadd.f32 %v1678_v51, %v1012_v11  ;;  %v1085_v25 = vmul.f32 %v512_v14, %v512_v14 }
 0x13c   :  { %v1682_v22 = vpop.f32.mrf.mxu0  ;;  %v2045_v23 = vpop.f32.mrf.mxu1 }
 0x13d   :  { %v1014_v24 = vadd.f32 %v1013_v20, %v512_v14  ;;  %v1147_v27 = vadd.f32 %v1146_v18, %v1084_v17  ;;  %v1476_v29 = vpack.c.bf16 %v1682_v22, %v1681_v5  ;;  %v1556_v31 = vpack.c.bf16 %v2045_v23, %v2041_v8 }
 0x13e   :  { %v515_v30 = vpop.f32.mrf.mxu0  ;;  %v2049_v32 = vpop.f32.mrf.mxu1  ;;  %v1088_v57 = vmul.f32 %v1682_v22, %v1682_v22 }
 0x13f   :  { %v1148_v34 = vadd.f32 %v1147_v27, %v1085_v25  ;;  %1580 = vst [vmem:[#allocation8 + $0x68] sm:$0xff] %v1476_v29   ;;  %v1471_v35 = vpack.c.bf16 %v515_v30, %v512_v14  ;;  %v1015_v37 = vadd.f32 %v1014_v24, %v515_v30  ;;  %v1086_v38 = vmul.f32 %v515_v30, %v515_v30 }
 0x140   :  { %v1685_v39 = vpop.f32.mrf.mxu0  ;;  %1596 = vst [vmem:[#allocation8 + $0xe8] sm:$0xff] %v1556_v31   ;;  %v1551_v42 = vpack.c.bf16 %v2049_v32, %v2043_v15  ;;  %v2053_v46 = vpop.f32.mrf.mxu1 }
 0x141   :  { %1579 = vst [vmem:[#allocation8 + $0x60] sm:$0xff] %v1471_v35   ;;  %v1016_v49 = vadd.f32 %v1681_v5, %v1015_v37  ;;  %v1149_v51 = vadd.f32 %v1148_v34, %v1086_v38 }
 0x142   :  { %v528_v53 = vpop.f32.mrf.mxu0  ;;  %1595 = vst [vmem:[#allocation8 + $0xe0] sm:$0xff] %v1551_v42   ;;  %v2055_v55 = vpop.f32.mrf.mxu1 }
 0x143   :  { %v1150_v58 = vadd.f32 %v1149_v51, %v1087_v47  ;;  %v1017_v59 = vadd.f32 %v1682_v22, %v1016_v49  ;;  %v1089_v3 = vmul.f32 %v528_v53, %v528_v53  ;;  %v1091_v22 = vmul.f32 %v1685_v39, %v1685_v39 }
 0x144   :  { %v1686_v60 = vpop.f32.mrf.mxu0  ;;  %v2057_v0 = vpop.f32.mrf.mxu1 }
 0x145   :  { %v1018_v1 = vadd.f32 %v1017_v59, %v528_v53  ;;  %v1151_v4 = vadd.f32 %v1150_v58, %v1088_v57  ;;  %v1486_v6 = vpack.c.bf16 %v1686_v60, %v1685_v39  ;;  %v1566_v5 = vpack.c.bf16 %v2057_v0, %v2053_v46 }
 0x146   :  { %v531_v10 = vpop.f32.mrf.mxu0  ;;  %v2061_v11 = vpop.f32.mrf.mxu1  ;;  %v1092_v27 = vmul.f32 %v1686_v60, %v1686_v60 }
 0x147   :  { %v1152_v12 = vadd.f32 %v1151_v4, %v1089_v3  ;;  %1582 = vst [vmem:[#allocation8 + $0x78] sm:$0xff] %v1486_v6   ;;  %v1481_v14 = vpack.c.bf16 %v531_v10, %v528_v53  ;;  %v1019_v17 = vadd.f32 %v1018_v1, %v531_v10  ;;  %v1090_v18 = vmul.f32 %v531_v10, %v531_v10 }
 0x148   :  { %1598 = vst [vmem:[#allocation8 + $0xf8] sm:$0xff] %v1566_v5   ;;  %v1561_v20 = vpack.c.bf16 %v2061_v11, %v2055_v55 }
 0x149   :  { %1581 = vst [vmem:[#allocation8 + $0x70] sm:$0xff] %v1481_v14   ;;  %v1020_v24 = vadd.f32 %v1685_v39, %v1019_v17  ;;  %v1153_v25 = vadd.f32 %v1152_v12, %v1090_v18 }
 0x14a   :  { %1597 = vst [vmem:[#allocation8 + $0xf0] sm:$0xff] %v1561_v20  }
 0x14b   :  { %v1021_v29 = vadd.f32 %v1686_v60, %v1020_v24  ;;  %v1154_v30 = vadd.f32 %v1153_v25, %v1091_v22 }
 0x14c   :  { %1854 = shalt.err (!%p1851_p5)
}
 0x14d   :  { %1206 = dma.vmem_to_hbm [thread:$0]  %s1201_s3, 4096, %s2177_s4, [#allocation4], %s1912_s23, %s1912_s23, %s1913_s24   ;;  %v1093_v31 = vmul.f32 %v1971_v43, %v1971_v43  ;;  %v1155_v34 = vadd.f32 %v1154_v30, %v1092_v27  ;;  %v1022_v35 = vadd.f32 %v1021_v29, %v1971_v43  ;;  %v1094_v38 = vmul.f32 %v1977_v50, %v1977_v50 }
 0x14e   :  { %v1095_v42 = vmul.f32 %v1969_v41, %v1969_v41  ;;  %v1096_v51 = vmul.f32 %v1973_v45, %v1973_v45  ;;  %v1097_v58 = vmul.f32 %v1983_v61, %v1983_v61  ;;  %v1098_v1 = vmul.f32 %v1989_v9, %v1989_v9  ;;  %s1917_s4 = smov [#allocation9]   ;;  %s1918_s17 = smov [#allocation11]  }
 0x14f   :  { %v1023_v37 = vadd.f32 %v1022_v35, %v1977_v50  ;;  %v1156_v39 = vadd.f32 %v1155_v34, %v1093_v31  ;;  %v1101_v5 = vmul.f32 %v1995_v21, %v1995_v21  ;;  %v1102_v17 = vmul.f32 %v2001_v33, %v2001_v33  ;;  %s1213_s16 = sshll.u32 %s1917_s4, 4  ;;  %s1223_s18 = sshll.u32 %s1918_s17, 4  ;;  %s1214_s16 = int_to_ptr.vmem [resolvable:$true] %s1213_s16  ;;  %s1224_s18 = int_to_ptr.vmem [resolvable:$true] %s1223_s18 }
 0x150   :  { %v1105_v25 = vmul.f32 %v2007_v48, %v2007_v48  ;;  %v1106_v30 = vmul.f32 %v2013_v63, %v2013_v63  ;;  %s1863_s19 = scalar_lea.vmem %s1214_s16, 16  ;;  %s1867_s20 = scalar_lea.vmem %s1214_s16, 32 }
 0x151   :  { %v1024_v47 = vadd.f32 %v1969_v41, %v1023_v37  ;;  %v1157_v49 = vadd.f32 %v1156_v39, %v1094_v38  ;;  %v1099_v41 = vmul.f32 %v1981_v56, %v1981_v56  ;;  %v1109_v38 = vmul.f32 %v2019_v13, %v2019_v13  ;;  %p1864_p6 = scmp.ne.s32.totalorder %s1214_s16, %s1863_s19  ;;  %p1868_p7 = scmp.lt.s32.totalorder %s1214_s16, %s1214_s16 }
 0x152   :  { %p1869_p8 = scmp.lt.s32.totalorder %s1867_s20, %s1863_s19 }
 0x153   :  { %v1158_v53 = vadd.f32 %v1157_v49, %v1095_v42  ;;  %v1025_v57 = vadd.f32 %v1973_v45, %v1024_v47  ;;  %v1100_v45 = vmul.f32 %v1985_v2, %v1985_v2  ;;  %v1110_v47 = vmul.f32 %v2025_v28, %v2025_v28 }
 0x154   :  { %p1870_p9 = por %p1869_p8, %p1868_p7 }
 0x155   :  { %v1026_v43 = vadd.f32 %v1025_v57, %v1983_v61  ;;  %v1159_v59 = vadd.f32 %v1158_v53, %v1096_v51 }
 0x156   :  { %p1871_p10 = pnand %p1870_p9, %p1864_p6 }
 0x157   :  { %v1160_v50 = vadd.f32 %v1159_v59, %v1097_v58  ;;  %v1027_v60 = vadd.f32 %v1026_v43, %v1989_v9  ;;  %v1113_v43 = vmul.f32 %v2031_v44, %v2031_v44 }
 0x159   :  { %v1028_v3 = vadd.f32 %v1981_v56, %v1027_v60  ;;  %v1161_v4 = vadd.f32 %v1160_v50, %v1098_v1  ;;  %v1103_v56 = vmul.f32 %v1993_v16, %v1993_v16  ;;  %v1114_v50 = vmul.f32 %v2037_v62, %v2037_v62 }
 0x15b   :  { %v1162_v6 = vadd.f32 %v1161_v4, %v1099_v41  ;;  %v1029_v10 = vadd.f32 %v1985_v2, %v1028_v3  ;;  %v1104_v2 = vmul.f32 %v1997_v26, %v1997_v26  ;;  %v1117_v4 = vmul.f32 %v2043_v15, %v2043_v15 }
 0x15d   :  { %v1030_v61 = vadd.f32 %v1029_v10, %v1995_v21  ;;  %v1163_v12 = vadd.f32 %v1162_v6, %v1100_v45  ;;  %v1118_v10 = vmul.f32 %v2049_v32, %v2049_v32 }
 0x15f   :  { %v1164_v14 = vadd.f32 %v1163_v12, %v1101_v5  ;;  %v1031_v9 = vadd.f32 %v1030_v61, %v2001_v33 }
 0x161   :  { %v1032_v18 = vadd.f32 %v1993_v16, %v1031_v9  ;;  %v1165_v20 = vadd.f32 %v1164_v14, %v1102_v17  ;;  %v1107_v16 = vmul.f32 %v2005_v40, %v2005_v40  ;;  %v1121_v9 = vmul.f32 %v2055_v55, %v2055_v55 }
 0x163   :  { %v1166_v22 = vadd.f32 %v1165_v20, %v1103_v56  ;;  %v1033_v24 = vadd.f32 %v1997_v26, %v1032_v18  ;;  %v1108_v26 = vmul.f32 %v2009_v54, %v2009_v54  ;;  %v1122_v18 = vmul.f32 %v2061_v11, %v2061_v11 }
 0x165   :  { %v1034_v21 = vadd.f32 %v1033_v24, %v2007_v48  ;;  %v1167_v27 = vadd.f32 %v1166_v22, %v1104_v2 }
 0x167   :  { %v1168_v29 = vadd.f32 %v1167_v27, %v1105_v25  ;;  %v1035_v33 = vadd.f32 %v1034_v21, %v2013_v63 }
 0x169   :  { %v1036_v31 = vadd.f32 %v2005_v40, %v1035_v33  ;;  %v1169_v34 = vadd.f32 %v1168_v29, %v1106_v30  ;;  %v1111_v40 = vmul.f32 %v2017_v7, %v2017_v7 }
 0x16b   :  { %v1170_v35 = vadd.f32 %v1169_v34, %v1107_v16  ;;  %v1037_v37 = vadd.f32 %v2009_v54, %v1036_v31  ;;  %v1112_v54 = vmul.f32 %v2021_v19, %v2021_v19 }
 0x16d   :  { %v1038_v48 = vadd.f32 %v1037_v37, %v2019_v13  ;;  %v1171_v39 = vadd.f32 %v1170_v35, %v1108_v26 }
 0x16f   :  { %v1172_v42 = vadd.f32 %v1171_v39, %v1109_v38  ;;  %v1039_v63 = vadd.f32 %v1038_v48, %v2025_v28 }
 0x171   :  { %v1040_v49 = vadd.f32 %v2017_v7, %v1039_v63  ;;  %v1173_v51 = vadd.f32 %v1172_v42, %v1110_v47  ;;  %v1115_v7 = vmul.f32 %v2029_v36, %v2029_v36 }
 0x173   :  { %v1174_v53 = vadd.f32 %v1173_v51, %v1111_v40  ;;  %v1041_v57 = vadd.f32 %v2021_v19, %v1040_v49  ;;  %v1116_v19 = vmul.f32 %v2033_v52, %v2033_v52 }
 0x175   :  { %v1042_v13 = vadd.f32 %v1041_v57, %v2031_v44  ;;  %v1175_v58 = vadd.f32 %v1174_v53, %v1112_v54 }
 0x177   :  { %v1176_v59 = vadd.f32 %v1175_v58, %v1113_v43  ;;  %v1043_v28 = vadd.f32 %v1042_v13, %v2037_v62 }
 0x179   :  { %v1044_v60 = vadd.f32 %v2029_v36, %v1043_v28  ;;  %v1177_v1 = vadd.f32 %v1176_v59, %v1114_v50  ;;  %v1119_v36 = vmul.f32 %v2041_v8, %v2041_v8 }
 0x17b   :  { %v1178_v41 = vadd.f32 %v1177_v1, %v1115_v7  ;;  %v1045_v3 = vadd.f32 %v2033_v52, %v1044_v60  ;;  %v1120_v52 = vmul.f32 %v2045_v23, %v2045_v23 }
 0x17d   :  { %v1046_v44 = vadd.f32 %v1045_v3, %v2043_v15  ;;  %v1179_v45 = vadd.f32 %v1178_v41, %v1116_v19 }
 0x17f   :  { %v1180_v6 = vadd.f32 %v1179_v45, %v1117_v4  ;;  %v1047_v62 = vadd.f32 %v1046_v44, %v2049_v32 }
 0x181   :  { %v1048_v61 = vadd.f32 %v2041_v8, %v1047_v62  ;;  %v1181_v5 = vadd.f32 %v1180_v6, %v1118_v10  ;;  %v1123_v8 = vmul.f32 %v2053_v46, %v2053_v46 }
 0x183   :  { %v1182_v12 = vadd.f32 %v1181_v5, %v1119_v36  ;;  %v1049_v14 = vadd.f32 %v2045_v23, %v1048_v61  ;;  %v1124_v23 = vmul.f32 %v2057_v0, %v2057_v0 }
 0x185   :  { %v1050_v15 = vadd.f32 %v1049_v14, %v2055_v55  ;;  %v1183_v17 = vadd.f32 %v1182_v12, %v1120_v52 }
 0x187   :  { %v1184_v56 = vadd.f32 %v1183_v17, %v1121_v9  ;;  %v1051_v32 = vadd.f32 %v1050_v15, %v2061_v11 }
 0x189   :  { %v1052_v20 = vadd.f32 %v2053_v46, %v1051_v32  ;;  %v1185_v2 = vadd.f32 %v1184_v56, %v1122_v18 }
 0x18b   :  { %v1053_v22 = vadd.f32 %v2057_v0, %v1052_v20  ;;  %v1186_v24 = vadd.f32 %v1185_v2, %v1123_v8 }
 0x18d   :  { %v1054_v55 = vrot.slane %v1053_v22, 4  ;;  %v1187_v21 = vadd.f32 %v1186_v24, %v1124_v23 }
 0x18f   :  { %v1188_v25 = vrot.slane %v1187_v21, 4  ;;  %v1055_v27 = vadd.f32 %v1054_v55, %v1053_v22 }
 0x191   :  { %v1056_v29 = vrot.slane %v1055_v27, 2  ;;  %v1189_v33 = vadd.f32 %v1188_v25, %v1187_v21 }
 0x193   :  { %v1057_v30 = vadd.f32 %v1056_v29, %v1055_v27  ;;  %v1190_v11 = vrot.slane %v1189_v33, 2 }
 0x195   :  { %v1058_v16 = vrot.slane %v1057_v30, 1  ;;  %v1191_v31 = vadd.f32 %v1190_v11, %v1189_v33 }
 0x197   :  { %v1059_v46 = vadd.f32 %v1058_v16, %v1057_v30  ;;  %v1192_v34 = vrot.slane %v1191_v31, 1 }
 0x199   :  { %1060 = vst [vmem:[#allocation9] sm:$0x1] %v1059_v46  ;;  %v1193_v0 = vadd.f32 %v1192_v34, %v1191_v31 }
 0x19a   :  { %1874 = shalt.err (!%p1871_p10)
}
 0x19b   :  { %1216 = dma.vmem_to_hbm [thread:$0]  %s1214_s16, 16, %s2178_s5, [#allocation10]   ;;  %1194 = vst [vmem:[#allocation11] sm:$0x1] %v1193_v0 }
 0x19c   :  { %s1883_s22 = scalar_lea.vmem %s1224_s18, 16  ;;  %s1887_s23 = scalar_lea.vmem %s1224_s18, 32 }
 0x19d   :  { %p1884_p11 = scmp.ne.s32.totalorder %s1224_s18, %s1883_s22  ;;  %p1888_p12 = scmp.lt.s32.totalorder %s1224_s18, %s1224_s18 }
 0x19e   :  { %p1889_p13 = scmp.lt.s32.totalorder %s1887_s23, %s1883_s22 }
 0x1a0   :  { %p1890_p0 = por %p1889_p13, %p1888_p12 }
 0x1a2   :  { %p1891_p1 = pnand %p1890_p0, %p1884_p11 }
 0x1a4   :  { %1894 = shalt.err (!%p1891_p1)
}
 0x1a5   :  { %1226 = dma.vmem_to_hbm [thread:$0]  %s1224_s18, 16, %s2179_s6, [#allocation10]  }
 0x1a6   :  { %1907 = dma.done.wait [#allocation4], 4096  }
 0x1a7   :  { %1908 = vsyncadd [#allocation4], 4294963200 }
 0x1a8   :  { %1909 = dma.done.wait [#allocation10], 32  }
 0x1a9   :  { %1910 = vsyncadd [#allocation10], 4294967264 }
 0x1aa   :  { %1236 = vsyncpa [#allocation3], 1 }
 0x1ab   :  { %1237 = vsyncpa [#allocation6], 1 }
 0x1ac   :  { %1238 = vsyncpa [#allocation4], 1 }
 0x1ad   :  { %1239 = vsyncpa [#allocation10], 1 }

</bundles_post_ra>
